<compile_context>
chip_gen: v5e
topology: v5e:2x2
jax: 0.10.0
libtpu: 0.0.40
codegen_flags: <defaults>
</compile_context>

<pallas_src>
import jax
import jax.numpy as jnp
from jax.experimental import pallas as pl
from jax.experimental.pallas import tpu as pltpu


def _scale_kernel(scale_ref, x_ref, o_ref):
    # scale_ref: (1,) f32 in SMEM; x_ref / o_ref: VMEM tiles (same dtype as x).
    s = scale_ref[0]
    x = x_ref[...]
    if x.dtype == jnp.float32 or x.dtype == jnp.bfloat16:
        # Native-dtype multiply (bf16 VALU on v6e/v7x); one cast of the scalar.
        o_ref[...] = (x * s.astype(x.dtype)).astype(o_ref.dtype)
    else:
        # fp8 / f16 etc.: multiply in f32, downcast once to the output dtype.
        o_ref[...] = (x.astype(jnp.float32) * s).astype(o_ref.dtype)


def _round_up(v: int, m: int) -> int:
    return ((v + m - 1) // m) * m


def scale_forward(x: jax.Array, scale, *, force_kernel: bool = False,
                  tile_bytes: int = 8 << 20) -> jax.Array:
    """y = x * scale (Scale.forward). `scale` is a scalar float parameter."""
    orig_shape = x.shape
    orig_dtype = x.dtype
    total = x.size
    itemsize = jnp.dtype(orig_dtype).itemsize

    scale_f32 = jnp.asarray(scale, dtype=jnp.float32).reshape(())

    # ---- XLA fallback paths (strictly cheaper than launching the kernel) ----
    #  * empty input
    #  * ragged element count (total % 128 != 0): wrapping the kernel in
    #    pad + slice would cost ~3x HBM traffic; the fused XLA multiply is
    #    already at the bandwidth roofline for this memory-bound op.
    #  * tiny inputs (< 256 KiB): fixed dispatch overhead exceeds the DMA time.
    ragged = (total % 128) != 0
    tiny = total * itemsize < (256 << 10)
    if total == 0 or ragged or (tiny and not force_kernel):
        if orig_dtype == jnp.float32 or orig_dtype == jnp.bfloat16:
            return (x * scale_f32.astype(orig_dtype)).astype(orig_dtype)
        return (x.astype(jnp.float32) * scale_f32).astype(orig_dtype)

    # ---- lane-dense layout: exact reshape, no padding, no trailing slice ----
    if total % 512 == 0:
        cols = 512
    elif total % 256 == 0:
        cols = 256
    else:
        cols = 128
    rows = total // cols
    x2d = x.reshape(rows, cols)          # free (contiguous bitcast-reshape)

    # ---- tile sizing: ~tile_bytes per block, scaled by dtype width --------
    tile_r = max(8, (tile_bytes // (cols * itemsize)) // 8 * 8)
    if rows <= tile_r:
        tile_r = rows                    # single block; full-dim is always legal
    else:
        # Best-effort: keep the number of grid steps even so the "parallel"
        # axis load-balances across v7x's two TensorCores.
        grid_len = pl.cdiv(rows, tile_r)
        if grid_len % 2 == 1:
            cand = _round_up(-(-rows // (grid_len + 1)), 8)
            if 8 <= cand <= rows and pl.cdiv(rows, cand) % 2 == 0:
                tile_r = cand

    grid = (pl.cdiv(rows, tile_r),)      # partial last block handled by masking

    out = pl.pallas_call(
        _scale_kernel,
        out_shape=jax.ShapeDtypeStruct((rows, cols), orig_dtype),
        grid=grid,
        in_specs=[
            pl.BlockSpec(memory_space=pltpu.SMEM),            # scale scalar
            pl.BlockSpec((tile_r, cols), lambda i: (i, 0)),   # contiguous row tile
        ],
        out_specs=pl.BlockSpec((tile_r, cols), lambda i: (i, 0)),
        compiler_params=pltpu.CompilerParams(
            dimension_semantics=("parallel",),                # no reduction axis
            vmem_limit_bytes=48 << 20,                        # 4 x 8 MiB buffers fit
        ),
    )(scale_f32.reshape(1), x2d)

    return out.reshape(orig_shape)


if __name__ == "__main__":
    key = jax.random.PRNGKey(0)
    k1, k2, k3 = jax.random.split(key, 3)

    scale_param = jnp.float32(1.5)   # matches nn.Parameter(torch.tensor(1.5))

    # 1) Primary small NCHW case (Scale after a conv); force the kernel path so
    #    the Pallas kernel itself is exercised despite the small-input fast path.
    x1 = jax.random.normal(k1, (2, 4, 16, 16), dtype=jnp.float32)
    y1 = jax.block_until_ready(scale_forward(x1, scale_param, force_kernel=True))
    ref1 = x1 * scale_param
    assert y1.shape == x1.shape and y1.dtype == x1.dtype
    assert jnp.allclose(y1, ref1, atol=1e-6, rtol=1e-6)

    # 2) bf16 activations with a deliberately small tile so the kernel runs a
    #    multi-step grid with a masked partial last block.
    x2 = jax.random.normal(k2, (4, 32, 24, 24), dtype=jnp.bfloat16)
    y2 = jax.block_until_ready(
        scale_forward(x2, scale_param, force_kernel=True, tile_bytes=64 << 10))
    ref2 = (x2 * scale_param.astype(jnp.bfloat16)).astype(jnp.bfloat16)
    assert y2.shape == x2.shape and y2.dtype == x2.dtype
    assert jnp.allclose(y2.astype(jnp.float32), ref2.astype(jnp.float32),
                        atol=1e-2, rtol=1e-2)

    # 3) Ragged / tiny input exercises the fused-XLA fallback path.
    x3 = jax.random.normal(k3, (3, 5, 7), dtype=jnp.float32)
    y3 = jax.block_until_ready(scale_forward(x3, scale_param))
    ref3 = x3 * scale_param
    assert y3.shape == x3.shape and y3.dtype == x3.dtype
    assert jnp.allclose(y3, ref3, atol=1e-6, rtol=1e-6)

    print("KERNEL_OK")
</pallas_src>

<mosaic_0001>
module attributes {stable_mosaic.version = 11 : i64} {
  func.func @_scale_kernel(%arg0: i32, %arg1: memref<1xf32, #tpu.memory_space<smem>>, %arg2: memref<4x512xf32, #tpu.memory_space<vmem>>, %arg3: memref<4x512xf32, #tpu.memory_space<vmem>>) attributes {dimension_semantics = [#tpu.dimension_semantics<parallel>], iteration_bounds = array<i64: 1>, scalar_prefetch = 0 : i64, scratch_operands = 0 : i64, tpu.core_type = #tpu.core_type<tc>, window_params = [{transform_indices = @transform_0, window_bounds = array<i64: 1>}, {transform_indices = @transform_1, window_bounds = array<i64: 4, 512>}, {transform_indices = @transform_2, window_bounds = array<i64: 4, 512>}]} {
    %c0 = arith.constant 0 : index
    %0 = memref.load %arg1[%c0] : memref<1xf32, #tpu.memory_space<smem>>
    %c0_0 = arith.constant 0 : index
    %c0_1 = arith.constant 0 : index
    %1 = vector.load %arg2[%c0_0, %c0_1] : memref<4x512xf32, #tpu.memory_space<vmem>>, vector<4x512xf32>
    %2 = vector.broadcast %0 : f32 to vector<4x512xf32>
    %3 = arith.mulf %1, %2 : vector<4x512xf32>
    %c0_2 = arith.constant 0 : index
    %c0_3 = arith.constant 0 : index
    %4 = vector.load %arg3[%c0_2, %c0_3] : memref<4x512xf32, #tpu.memory_space<vmem>>, vector<4x512xf32>
    tpu.vector_store %arg3[%c0_2, %c0_3], %3 {strides = array<i32>} : memref<4x512xf32, #tpu.memory_space<vmem>>, vector<4x512xf32>,
    return
  }
  func.func @transform_0(%arg0: i32) -> i32 {
    %c0_i32 = arith.constant 0 : i32
    %c0_i32_0 = arith.constant 0 : i32
    return %c0_i32 : i32
  }
  func.func @transform_1(%arg0: i32) -> (i32, i32) {
    %c0_i32 = arith.constant 0 : i32
    %c0_i32_0 = arith.constant 0 : i32
    return %arg0, %c0_i32 : i32, i32
  }
  func.func @transform_2(%arg0: i32) -> (i32, i32) {
    %c0_i32 = arith.constant 0 : i32
    %c0_i32_0 = arith.constant 0 : i32
    return %arg0, %c0_i32 : i32, i32
  }
}

</mosaic_0001>

<bundles_post_ra>
// kernel: tpu_custom_call.1
= control target key start
LH: loop header
LB: loop body
LE: loop exit
PB: predicated region body
PF: predicated region fallthrough
CT: control target
= control target key end

     0   :  { %8 = vsyncpa [#allocation4], 0  ;;  %s132_s0 = inlined_call_operand.<no memory space> [shape: f32[1], index: 0, kind: input, shape index: {}]   ;;  %s133_s1 = inlined_call_operand.hbm [shape: f32[4,512], index: 1, kind: input, shape index: {}]   ;;  %s134_s2 = inlined_call_operand.hbm [shape: f32[4,512], index: 2, kind: output, shape index: {}]  }
   0x1   :  { %9 = vsyncpa [#allocation5], 0  ;;  %s17_s11 = sshll.u32 %s133_s1, 4  ;;  %s106_s12 = smov [#allocation3]   ;;  %s18_s11 = int_to_ptr.hbm [resolvable:$true] %s17_s11 }
   0x2   :  { %s19_s13 = sshll.u32 %s106_s12, 4  ;;  %s20_s13 = int_to_ptr.vmem [resolvable:$true] %s19_s13 }
   0x3   :  { %22 = dma.hbm_to_vmem [thread:$0]  %s18_s11, 256, %s20_s13, [#allocation4]  }
   0x4   :  { %102 = dma.done.wait [#allocation4], 256  }
   0x5   :  { %103 = vsyncadd [#allocation4], 4294967040  ;;  %v30_v0 = vstv %s132_s0  ;;  %s107_s16 = smov [#allocation6]   ;;  %s42_s20 = sshll.u32 %s134_s2, 4  ;;  %v28_v1 = vld [vmem:[#allocation3] sm:$0xff]  ;;  %v29_v2 = vld [vmem:[#allocation3 + $0x8] sm:$0xff]  ;;  %s43_s20 = int_to_ptr.hbm [resolvable:$true] %s42_s20 }
   0x6   :  { %s40_s17 = sshll.u32 %s107_s16, 4  ;;  %v31_v3 = vmul.f32 %v30_v0, %v28_v1  ;;  %v32_v4 = vmul.f32 %v30_v0, %v29_v2  ;;  %s41_s17 = int_to_ptr.vmem [resolvable:$true] %s40_s17 }
   0x8   :  { %33 = vst [vmem:[#allocation6] sm:$0xff] %v31_v3 }
   0x9   :  { %34 = vst [vmem:[#allocation6 + $0x8] sm:$0xff] %v32_v4 }
   0xa   :  { %45 = dma.vmem_to_hbm [thread:$0]  %s41_s17, 256, %s43_s20, [#allocation5]  }
   0xb   :  { %104 = dma.done.wait [#allocation5], 256  }
   0xc   :  { %105 = vsyncadd [#allocation5], 4294967040 }
   0xd   :  { %50 = vsyncpa [#allocation4], 1 }
   0xe   :  { %51 = vsyncpa [#allocation5], 1 }

</bundles_post_ra>
